<compile_context>
chip_gen: v7x
topology: tpu7x:2x2x1
jax: 0.10.0
libtpu: 0.0.40
codegen_flags: <defaults>
</compile_context>

<pallas_src>
import functools

import jax
import jax.numpy as jnp
from jax.experimental import pallas as pl
from jax.experimental.pallas import tpu as pltpu

B, L, A = 4, 16, 21      # batch, protein_len, aa_labels (20 aa + gap)
ZD, H, HD = 6, 32, 16    # z_dim, encoder hidden, discriminator hidden

SMALL_W = 128            # lane-dense packed small-output width
A_PAD = 128              # per-position conv lane width (21 -> 128)

# bias-slab row assignments
_B_ENC, _B_MV, _B_Z, _B_RC = 0, 1, 2, 3


def _round_up(n, m):
    return ((n + m - 1) // m) * m


def ss_infovae_kernel(xf_ref, xpos_ref, eps_ref, We_ref, Wmv_ref, Wz_ref,
                      Wrc_ref, Wgx_ref, bias_ref,
                      conv_ref, zlog_ref, small_ref,
                      *, zd, hid, hd_dim, la_pad):
    f32 = jnp.float32
    xf = xf_ref[...]                                                 # (Bp, LAp)

    # ----- encoder (self.inference): x -> (z_mu, raw_logvar); fused mu|var head -----
    h = jnp.maximum(
        jnp.dot(xf, We_ref[...], preferred_element_type=f32)
        + bias_ref[_B_ENC:_B_ENC + 1, 0:hid], 0.0)                   # (Bp, H)
    mv = (jnp.dot(h, Wmv_ref[...], preferred_element_type=f32)
          + bias_ref[_B_MV:_B_MV + 1, 0:2 * zd])                     # (Bp, 2*ZD)
    mu = mv[:, 0:zd]
    std = jnp.exp(0.5 * mv[:, zd:2 * zd])     # std = exp(0.5*w) == sqrt(exp(w))
    var = std * std                           # positive-variance link (synthetic)

    # ----- reparam trick: z = mu + eps * std, eps ~ U[0,1) (torch.rand_like) -----
    z = mu + eps_ref[...] * std                                      # (Bp, ZD)

    # ----- fused z-consumers: [cond_mapper∘generator(z-path) | discriminator L1] -----
    # Wz = [ W_cm @ kron(I_L, w_gz) | 0-pad | W_d1 | 0-pad ]   (ZD, la_pad + 128)
    zres = (jnp.dot(z, Wz_ref[...], preferred_element_type=f32)
            + bias_ref[_B_Z:_B_Z + 1, :])                            # (Bp, la_pad+128)
    zlog_ref[...] = zres[:, 0:la_pad]                                # z-part of logits
    hd = jnp.maximum(zres[:, la_pad:la_pad + hd_dim], 0.0)           # (Bp, HD)

    # ----- discriminator head: (y_pred_R, y_pred_C); fused r|c head -----
    rc = (jnp.dot(hd, Wrc_ref[...], preferred_element_type=f32)
          + bias_ref[_B_RC:_B_RC + 1, 0:2])                          # (Bp, 2)
    yr = rc[:, 0:1]
    yc = jax.nn.sigmoid(rc[:, 1:2])

    # ----- generator x-path: per-position 1x1 conv, (B*L, A_pad) @ (A_pad, A_pad) -----
    conv_ref[...] = jnp.dot(xpos_ref[...], Wgx_ref[...],
                            preferred_element_type=f32)              # (BL, A_PAD)

    # ----- lane-dense packed small outputs: [z | mu | var | yr | yc | 0-pad] -----
    used = 3 * zd + 2
    small_ref[...] = jnp.concatenate(
        [z, mu, var, yr, yc,
         jnp.zeros((z.shape[0], small_ref.shape[1] - used), f32)], axis=1)


def prepack_params(params, prot_len, aa_dim):
    """One-time packing of the 17 raw parameter tensors into 6 kernel inputs.

    Runs OUTSIDE the per-call jit (call once at init / param update)."""
    f32 = jnp.float32
    zd = params["W_mu"].shape[1]
    hid = params["W_enc"].shape[1]
    hd_dim = params["W_d1"].shape[1]
    la = prot_len * aa_dim
    la_pad = _round_up(la, 128)
    zw = la_pad + 128                       # fused z-weight / bias-slab lane width

    eye_l = jnp.eye(prot_len, dtype=f32)
    m_gz = jnp.kron(eye_l, params["w_gz"].astype(f32))          # (L, L*A), ~21 KB
    m_comb = params["W_cm"].astype(f32) @ m_gz                  # (ZD, L*A), ~8 KB

    we_p = jnp.zeros((la_pad, hid), f32).at[:la, :].set(params["W_enc"])
    wmv = jnp.concatenate([params["W_mu"], params["W_var"]], axis=1)      # (H, 2*ZD)
    wz = (jnp.zeros((zd, zw), f32)
          .at[:, :la].set(m_comb)
          .at[:, la_pad:la_pad + hd_dim].set(params["W_d1"]))             # (ZD, zw)
    wrc = jnp.concatenate([params["W_r"], params["W_c"]], axis=1)         # (HD, 2)
    wgx_p = jnp.zeros((A_PAD, A_PAD), f32).at[:aa_dim, :aa_dim].set(params["W_gx"])

    # generator/cond_mapper bias fold: zup @ M_gz + tile(b_g) == z @ M_comb + b_zlog
    b_zlog = (params["b_cm"].astype(f32) @ m_gz
              + jnp.tile(params["b_g"].astype(f32), (1, prot_len)))[0]    # (L*A,)

    bias = jnp.zeros((8, zw), f32)
    bias = bias.at[_B_ENC, :hid].set(params["b_enc"][0])
    bias = bias.at[_B_MV, :2 * zd].set(
        jnp.concatenate([params["b_mu"], params["b_var"]], axis=1)[0])
    bias = bias.at[_B_Z, :la].set(b_zlog)
    bias = bias.at[_B_Z, la_pad:la_pad + hd_dim].set(params["b_d1"][0])
    bias = bias.at[_B_RC, :2].set(
        jnp.concatenate([params["b_r"], params["b_c"]], axis=1)[0])

    return {"W_enc_p": we_p, "W_mv": wmv, "W_z": wz, "W_rc": wrc,
            "W_gx_p": wgx_p, "bias": bias}


@jax.jit
def ss_infovae_forward(x, eps, packed):
    f32 = jnp.float32
    bn, ln, an = x.shape
    zd = eps.shape[1]
    hid = packed["W_enc_p"].shape[1]
    hd_dim = packed["W_rc"].shape[0]
    la = ln * an
    la_pad = packed["W_enc_p"].shape[0]
    b_pad = max(8, _round_up(bn, 8))
    bl = bn * ln
    bl_pad = _round_up(bl, 8)

    # --- per-call input padding (only x / eps; all weight glue is prepacked) ---
    xf = jnp.zeros((b_pad, la_pad), f32).at[:bn, :la].set(x.reshape(bn, la))
    xpos = jnp.zeros((bl_pad, A_PAD), f32).at[:bl, :an].set(x.reshape(bl, an))
    eps_p = jnp.zeros((b_pad, zd), f32).at[:bn, :].set(eps)

    kernel = functools.partial(ss_infovae_kernel, zd=zd, hid=hid,
                               hd_dim=hd_dim, la_pad=la_pad)
    vmem = pl.BlockSpec(memory_space=pltpu.MemorySpace.VMEM)   # whole array resident

    conv, zlog, small = pl.pallas_call(
        kernel,
        out_shape=(
            jax.ShapeDtypeStruct((bl_pad, A_PAD), f32),    # x-path logits slab
            jax.ShapeDtypeStruct((b_pad, la_pad), f32),    # z-path logits slab
            jax.ShapeDtypeStruct((b_pad, SMALL_W), f32),   # packed small outputs
        ),
        in_specs=[vmem] * 9,
        out_specs=(vmem, vmem, vmem),
    )(xf, xpos, eps_p, packed["W_enc_p"], packed["W_mv"], packed["W_z"],
      packed["W_rc"], packed["W_gx_p"], packed["bias"])

    # --- combine the two lane-dense logits slabs (fused slice/reshape/add) ---
    logits = (conv[:bl, :an].reshape(bn, ln, an)
              + zlog[:bn, :la].reshape(bn, ln, an))
    z = small[:bn, 0:zd]
    mu = small[:bn, zd:2 * zd]
    var = small[:bn, 2 * zd:3 * zd]
    yr = small[:bn, 3 * zd:3 * zd + 1]
    yc = small[:bn, 3 * zd + 1:3 * zd + 2]
    return logits, yr, yc, z, mu, var


def ref_forward(x, eps, p):
    """Pure-JAX reference of the same synthetic SS_InfoVAE forward."""
    bn, ln, an = x.shape
    xf = x.reshape(bn, ln * an)
    h = jnp.maximum(xf @ p["W_enc"] + p["b_enc"], 0.0)
    mu = h @ p["W_mu"] + p["b_mu"]
    var = jnp.exp(h @ p["W_var"] + p["b_var"])
    z = mu + eps * jnp.sqrt(var)
    zup = z @ p["W_cm"] + p["b_cm"]                                 # (B, L)
    logits = (jnp.einsum("bla,ao->blo", x, p["W_gx"])
              + zup[:, :, None] * p["w_gz"] + p["b_g"])             # (B, L, A)
    hd = jnp.maximum(z @ p["W_d1"] + p["b_d1"], 0.0)
    yr = hd @ p["W_r"] + p["b_r"]
    yc = jax.nn.sigmoid(hd @ p["W_c"] + p["b_c"])
    return logits, yr, yc, z, mu, var


if __name__ == "__main__":
    key = jax.random.PRNGKey(0)
    keys = jax.random.split(key, 20)

    # x: amino-acid probability profile (batch, protein_len, aa_labels)
    x = jax.nn.softmax(jax.random.normal(keys[0], (B, L, A), jnp.float32), axis=-1)
    # reparam noise: torch.rand_like -> uniform [0, 1)
    eps = jax.random.uniform(keys[1], (B, ZD), dtype=jnp.float32)

    s = 0.05
    shapes = {
        "W_enc": (L * A, H), "b_enc": (1, H),
        "W_mu": (H, ZD), "b_mu": (1, ZD),
        "W_var": (H, ZD), "b_var": (1, ZD),
        "W_cm": (ZD, L), "b_cm": (1, L),
        "W_gx": (A, A), "w_gz": (1, A), "b_g": (1, A),
        "W_d1": (ZD, HD), "b_d1": (1, HD),
        "W_r": (HD, 1), "b_r": (1, 1),
        "W_c": (HD, 1), "b_c": (1, 1),
    }
    params = {
        name: s * jax.random.normal(keys[2 + i], shp, jnp.float32)
        for i, (name, shp) in enumerate(shapes.items())
    }

    # One-time packing (outside the per-call jit).
    packed = jax.tree_util.tree_map(jax.block_until_ready,
                                    prepack_params(params, L, A))

    outs = ss_infovae_forward(x, eps, packed)
    outs = jax.block_until_ready(outs)

    refs = ref_forward(x, eps, params)
    names = ["logits_xrc", "y_pred_R", "y_pred_C", "z", "z_mu", "z_var"]
    for name, o, r in zip(names, outs, refs):
        assert o.shape == r.shape, (name, o.shape, r.shape)
        assert jnp.allclose(o, r, atol=1e-4, rtol=1e-4), name

    print("KERNEL_OK")
</pallas_src>

<mosaic_0001>
module attributes {stable_mosaic.version = 11 : i64} {
  func.func @ss_infovae_kernel(%arg0: memref<8x384xf32, #tpu.memory_space<vmem>>, %arg1: memref<64x128xf32, #tpu.memory_space<vmem>>, %arg2: memref<8x6xf32, #tpu.memory_space<vmem>>, %arg3: memref<384x32xf32, #tpu.memory_space<vmem>>, %arg4: memref<32x12xf32, #tpu.memory_space<vmem>>, %arg5: memref<6x512xf32, #tpu.memory_space<vmem>>, %arg6: memref<16x2xf32, #tpu.memory_space<vmem>>, %arg7: memref<128x128xf32, #tpu.memory_space<vmem>>, %arg8: memref<8x512xf32, #tpu.memory_space<vmem>>, %arg9: memref<64x128xf32, #tpu.memory_space<vmem>>, %arg10: memref<8x384xf32, #tpu.memory_space<vmem>>, %arg11: memref<8x128xf32, #tpu.memory_space<vmem>>) attributes {dimension_semantics = [], scalar_prefetch = 0 : i64, scratch_operands = 0 : i64, tpu.core_type = #tpu.core_type<tc>} {
    %c0 = arith.constant 0 : index
    %c0_0 = arith.constant 0 : index
    %0 = vector.load %arg0[%c0, %c0_0] : memref<8x384xf32, #tpu.memory_space<vmem>>, vector<8x384xf32>
    %c0_1 = arith.constant 0 : index
    %c0_2 = arith.constant 0 : index
    %1 = vector.load %arg3[%c0_1, %c0_2] : memref<384x32xf32, #tpu.memory_space<vmem>>, vector<384x32xf32>
    %cst = arith.constant dense<0.000000e+00> : vector<8x32xf32>
    %2 = tpu.matmul %0, %1, %cst {dimension_numbers = #tpu.dot_dimension_numbers<[1], [0], [0], [1], [0, 0, 1, 1], [], []>} : vector<8x384xf32>, vector<384x32xf32>, vector<8x32xf32> -> vector<8x32xf32>
    %c0_3 = arith.constant 0 : index
    %c0_4 = arith.constant 0 : index
    %3 = vector.load %arg8[%c0_3, %c0_4] : memref<8x512xf32, #tpu.memory_space<vmem>>, vector<1x32xf32>
    %4 = vector.broadcast %3 : vector<1x32xf32> to vector<8x32xf32>
    %5 = arith.addf %2, %4 : vector<8x32xf32>
    %cst_5 = arith.constant 0.000000e+00 : f32
    %6 = vector.broadcast %cst_5 : f32 to vector<8x32xf32>
    %7 = arith.maximumf %5, %6 : vector<8x32xf32>
    %c0_6 = arith.constant 0 : index
    %c0_7 = arith.constant 0 : index
    %8 = vector.load %arg4[%c0_6, %c0_7] : memref<32x12xf32, #tpu.memory_space<vmem>>, vector<32x12xf32>
    %cst_8 = arith.constant dense<0.000000e+00> : vector<8x12xf32>
    %9 = tpu.matmul %7, %8, %cst_8 {dimension_numbers = #tpu.dot_dimension_numbers<[1], [0], [0], [1], [0, 0, 1, 1], [], []>} : vector<8x32xf32>, vector<32x12xf32>, vector<8x12xf32> -> vector<8x12xf32>
    %c1 = arith.constant 1 : index
    %c0_9 = arith.constant 0 : index
    %10 = vector.load %arg8[%c1, %c0_9] : memref<8x512xf32, #tpu.memory_space<vmem>>, vector<1x12xf32>
    %11 = vector.broadcast %10 : vector<1x12xf32> to vector<8x12xf32>
    %12 = arith.addf %9, %11 : vector<8x12xf32>
    %13 = vector.extract_strided_slice %12 {offsets = [0, 0], sizes = [8, 6], strides = [1, 1]} : vector<8x12xf32> to vector<8x6xf32>
    %14 = vector.extract_strided_slice %12 {offsets = [0, 6], sizes = [8, 6], strides = [1, 1]} : vector<8x12xf32> to vector<8x6xf32>
    %cst_10 = arith.constant 5.000000e-01 : f32
    %15 = vector.broadcast %cst_10 : f32 to vector<8x6xf32>
    %16 = arith.mulf %15, %14 : vector<8x6xf32>
    %17 = math.exp %16 : vector<8x6xf32>
    %18 = arith.mulf %17, %17 : vector<8x6xf32>
    %c0_11 = arith.constant 0 : index
    %c0_12 = arith.constant 0 : index
    %19 = vector.load %arg2[%c0_11, %c0_12] : memref<8x6xf32, #tpu.memory_space<vmem>>, vector<8x6xf32>
    %20 = arith.mulf %19, %17 : vector<8x6xf32>
    %21 = arith.addf %13, %20 : vector<8x6xf32>
    %c0_13 = arith.constant 0 : index
    %c0_14 = arith.constant 0 : index
    %22 = vector.load %arg5[%c0_13, %c0_14] : memref<6x512xf32, #tpu.memory_space<vmem>>, vector<6x512xf32>
    %cst_15 = arith.constant dense<0.000000e+00> : vector<8x512xf32>
    %23 = tpu.matmul %21, %22, %cst_15 {dimension_numbers = #tpu.dot_dimension_numbers<[1], [0], [0], [1], [0, 0, 1, 1], [], []>} : vector<8x6xf32>, vector<6x512xf32>, vector<8x512xf32> -> vector<8x512xf32>
    %c2 = arith.constant 2 : index
    %c0_16 = arith.constant 0 : index
    %24 = vector.load %arg8[%c2, %c0_16] : memref<8x512xf32, #tpu.memory_space<vmem>>, vector<1x512xf32>
    %25 = vector.broadcast %24 : vector<1x512xf32> to vector<8x512xf32>
    %26 = arith.addf %23, %25 : vector<8x512xf32>
    %27 = vector.extract_strided_slice %26 {offsets = [0, 0], sizes = [8, 384], strides = [1, 1]} : vector<8x512xf32> to vector<8x384xf32>
    %c0_17 = arith.constant 0 : index
    %c0_18 = arith.constant 0 : index
    %28 = vector.load %arg10[%c0_17, %c0_18] : memref<8x384xf32, #tpu.memory_space<vmem>>, vector<8x384xf32>
    tpu.vector_store %arg10[%c0_17, %c0_18], %27 {strides = array<i32>} : memref<8x384xf32, #tpu.memory_space<vmem>>, vector<8x384xf32>,
    %29 = vector.extract_strided_slice %26 {offsets = [0, 384], sizes = [8, 16], strides = [1, 1]} : vector<8x512xf32> to vector<8x16xf32>
    %cst_19 = arith.constant 0.000000e+00 : f32
    %30 = vector.broadcast %cst_19 : f32 to vector<8x16xf32>
    %31 = arith.maximumf %29, %30 : vector<8x16xf32>
    %c0_20 = arith.constant 0 : index
    %c0_21 = arith.constant 0 : index
    %32 = vector.load %arg6[%c0_20, %c0_21] : memref<16x2xf32, #tpu.memory_space<vmem>>, vector<16x2xf32>
    %cst_22 = arith.constant dense<0.000000e+00> : vector<8x2xf32>
    %33 = tpu.matmul %31, %32, %cst_22 {dimension_numbers = #tpu.dot_dimension_numbers<[1], [0], [0], [1], [0, 0, 1, 1], [], []>} : vector<8x16xf32>, vector<16x2xf32>, vector<8x2xf32> -> vector<8x2xf32>
    %c3 = arith.constant 3 : index
    %c0_23 = arith.constant 0 : index
    %34 = vector.load %arg8[%c3, %c0_23] : memref<8x512xf32, #tpu.memory_space<vmem>>, vector<1x2xf32>
    %35 = vector.broadcast %34 : vector<1x2xf32> to vector<8x2xf32>
    %36 = arith.addf %33, %35 : vector<8x2xf32>
    %37 = vector.extract_strided_slice %36 {offsets = [0, 0], sizes = [8, 1], strides = [1, 1]} : vector<8x2xf32> to vector<8x1xf32>
    %38 = vector.extract_strided_slice %36 {offsets = [0, 1], sizes = [8, 1], strides = [1, 1]} : vector<8x2xf32> to vector<8x1xf32>
    %39 = arith.negf %38 : vector<8x1xf32>
    %40 = math.exp %39 : vector<8x1xf32>
    %cst_24 = arith.constant 1.000000e+00 : f32
    %41 = vector.broadcast %cst_24 : f32 to vector<8x1xf32>
    %42 = arith.addf %41, %40 : vector<8x1xf32>
    %43 = arith.divf %41, %42 : vector<8x1xf32>
    %c0_25 = arith.constant 0 : index
    %c0_26 = arith.constant 0 : index
    %44 = vector.load %arg1[%c0_25, %c0_26] : memref<64x128xf32, #tpu.memory_space<vmem>>, vector<64x128xf32>
    %c0_27 = arith.constant 0 : index
    %c0_28 = arith.constant 0 : index
    %45 = vector.load %arg7[%c0_27, %c0_28] : memref<128x128xf32, #tpu.memory_space<vmem>>, vector<128x128xf32>
    %cst_29 = arith.constant dense<0.000000e+00> : vector<64x128xf32>
    %46 = tpu.matmul %44, %45, %cst_29 {dimension_numbers = #tpu.dot_dimension_numbers<[1], [0], [0], [1], [0, 0, 1, 1], [], []>} : vector<64x128xf32>, vector<128x128xf32>, vector<64x128xf32> -> vector<64x128xf32>
    %c0_30 = arith.constant 0 : index
    %c0_31 = arith.constant 0 : index
    %47 = vector.load %arg9[%c0_30, %c0_31] : memref<64x128xf32, #tpu.memory_space<vmem>>, vector<64x128xf32>
    tpu.vector_store %arg9[%c0_30, %c0_31], %46 {strides = array<i32>} : memref<64x128xf32, #tpu.memory_space<vmem>>, vector<64x128xf32>,
    %cst_32 = arith.constant 0.000000e+00 : f32
    %48 = vector.broadcast %cst_32 : f32 to vector<8x108xf32>
    %49 = tpu.concatenate %21, %13, %18, %37, %43, %48 in 1 : vector<8x6xf32>, vector<8x6xf32>, vector<8x6xf32>, vector<8x1xf32>, vector<8x1xf32>, vector<8x108xf32> -> vector<8x128xf32>
    %c0_33 = arith.constant 0 : index
    %c0_34 = arith.constant 0 : index
    %50 = vector.load %arg11[%c0_33, %c0_34] : memref<8x128xf32, #tpu.memory_space<vmem>>, vector<8x128xf32>
    tpu.vector_store %arg11[%c0_33, %c0_34], %49 {strides = array<i32>} : memref<8x128xf32, #tpu.memory_space<vmem>>, vector<8x128xf32>,
    return
  }
}

</mosaic_0001>

<bundles_post_ra>
// kernel: ss_infovae_forward.1
= control target key start
LH: loop header
LB: loop body
LE: loop exit
PB: predicated region body
PF: predicated region fallthrough
CT: control target
= control target key end

     0   :  { %v1066_v3 = vmov 0.0|0.0   ;;  %vm1067_vm0 = vmmov 0   ;;  %v1068_v4 = vmov 0.0   ;;  %vm233_vm1 = vcmask 261120   ;;  %s1069_s20 = smov 122   ;;  %s1070_s21 = smov 6   ;;  %s1464_s3 = inlined_call_operand.vmem [shape: f32[384,32], index: 3, kind: input, shape index: {}]   ;;  %s1465_s0 = inlined_call_operand.vmem [shape: f32[8,384], index: 0, kind: input, shape index: {}]   ;;  %s1466_s4 = inlined_call_operand.vmem [shape: f32[32,12], index: 4, kind: input, shape index: {}]   ;;  %s1467_s8 = inlined_call_operand.vmem [shape: f32[8,512], index: 8, kind: input, shape index: {}]   ;;  %s1468_s5 = inlined_call_operand.vmem [shape: f32[6,512], index: 5, kind: input, shape index: {}]   ;;  %s1469_s2 = inlined_call_operand.vmem [shape: f32[8,6], index: 2, kind: input, shape index: {}]   ;;  %s1470_s6 = inlined_call_operand.vmem [shape: f32[16,2], index: 6, kind: input, shape index: {}]   ;;  %s1471_s7 = inlined_call_operand.vmem [shape: f32[128,128], index: 7, kind: input, shape index: {}]   ;;  %s1472_s10 = inlined_call_operand.vmem [shape: f32[8,384], index: 10, kind: output, shape index: {1}]   ;;  %s1473_s1 = inlined_call_operand.vmem [shape: f32[64,128], index: 1, kind: input, shape index: {}]   ;;  %s1474_s9 = inlined_call_operand.vmem [shape: f32[64,128], index: 9, kind: output, shape index: {0}]   ;;  %s1475_s11 = inlined_call_operand.vmem [shape: f32[8,128], index: 11, kind: output, shape index: {2}]  }
   0x1   :  { %v54_v0 = vld [vmem:[%s1464_s3 + $0x80] sm:$0xff]  ;;  %v55_v1 = vld [vmem:[%s1464_s3 + $0x88] sm:$0xff]  ;;  %1013 = vmatprep.subr.bf16.mxu1 %v1066_v3  ;;  %903 = vmatprep.mubr.msk.f32.mxu1 %vm1067_vm0, %v1068_v4  ;;  %v56_v7 = vld [vmem:[%s1464_s3 + $0x90] sm:$0xff]  ;;  %vm349_vm2 = vcmask 1045504   ;;  %vm345_vm3 = vcmask 48128   ;;  %vm511_vm4 = vcmask 130048  }
   0x2   :  { %v38_v2 = vld [vmem:[%s1464_s3] sm:$0xff]  ;;  %v957_v5 = vpack.c.bf16 %v55_v1, %v54_v0  ;;  %v39_v6 = vld [vmem:[%s1464_s3 + $0x8] sm:$0xff]  ;;  %v57_v8 = vld [vmem:[%s1464_s3 + $0x98] sm:$0xff]  ;;  %s1071_s12 = smov 18   ;;  %vm745_vm5 = vcmask 97280   ;;  %vm747_vm6 = vcmask 146432  }
   0x3   :  { %v959_v9 = vpack.c.bf16 %v39_v6, %v38_v2  ;;  %v961_v10 = vpack.c.bf16 %v57_v8, %v56_v7  ;;  %v40_v11 = vld [vmem:[%s1464_s3 + $0x10] sm:$0xff]  ;;  %v41_v12 = vld [vmem:[%s1464_s3 + $0x18] sm:$0xff]  ;;  %v58_v13 = vld [vmem:[%s1464_s3 + $0xa0] sm:$0xff]  ;;  %vm749_vm7 = vcmask 154624   ;;  %vm751_vm8 = vcmask 162816  }
   0x4   :  { %958 = vmatprep.subr.bf16.mxu0 %v957_v5  ;;  %v59_v14 = vld [vmem:[%s1464_s3 + $0xa8] sm:$0xff]  ;;  %v963_v15 = vpack.c.bf16 %v41_v12, %v40_v11  ;;  %v42_v17 = vld [vmem:[%s1464_s3 + $0x20] sm:$0xff]  ;;  %v60_v19 = vld [vmem:[%s1464_s3 + $0xb0] sm:$0xff] }
   0x5   :  { %960 = vmatpush3.bf16.msra.mxu0 %v959_v9  ;;  %v965_v16 = vpack.c.bf16 %v59_v14, %v58_v13  ;;  %v43_v18 = vld [vmem:[%s1464_s3 + $0x28] sm:$0xff]  ;;  %v61_v20 = vld [vmem:[%s1464_s3 + $0xb8] sm:$0xff]  ;;  %v44_v23 = vld [vmem:[%s1464_s3 + $0x30] sm:$0xff] }
   0x6   :  { %962 = vmatprep.subr.bf16.mxu0 %v961_v10  ;;  %v967_v21 = vpack.c.bf16 %v43_v18, %v42_v17  ;;  %v969_v22 = vpack.c.bf16 %v61_v20, %v60_v19  ;;  %v45_v24 = vld [vmem:[%s1464_s3 + $0x38] sm:$0xff]  ;;  %v62_v25 = vld [vmem:[%s1464_s3 + $0xc0] sm:$0xff]  ;;  %v63_v26 = vld [vmem:[%s1464_s3 + $0xc8] sm:$0xff] }
   0x7   :  { %v36_v27 = vld [vmem:[%s1465_s0 + $0x8] sm:$0xff]  ;;  %v971_v28 = vpack.c.bf16 %v45_v24, %v44_v23  ;;  %v973_v29 = vpack.c.bf16 %v63_v26, %v62_v25  ;;  %v46_v30 = vld [vmem:[%s1464_s3 + $0x40] sm:$0xff]  ;;  %v64_v32 = vld [vmem:[%s1464_s3 + $0xd0] sm:$0xff] }
   0x8   :  { %151 = vmatprep.mubr.f32.mxu0 %v36_v27  ;;  %v47_v31 = vld [vmem:[%s1464_s3 + $0x48] sm:$0xff]  ;;  %v65_v33 = vld [vmem:[%s1464_s3 + $0xd8] sm:$0xff]  ;;  %v48_v36 = vld [vmem:[%s1464_s3 + $0x50] sm:$0xff] }
   0x9   :  { %964 = vmatpush3.bf16.msra.mxu0 %v963_v15  ;;  %v975_v34 = vpack.c.bf16 %v47_v31, %v46_v30  ;;  %v977_v35 = vpack.c.bf16 %v65_v33, %v64_v32  ;;  %v49_v37 = vld [vmem:[%s1464_s3 + $0x58] sm:$0xff]  ;;  %v66_v38 = vld [vmem:[%s1464_s3 + $0xe0] sm:$0xff]  ;;  %v67_v39 = vld [vmem:[%s1464_s3 + $0xe8] sm:$0xff] }
   0xa   :  { %966 = vmatprep.subr.bf16.mxu0 %v965_v16  ;;  %v979_v40 = vpack.c.bf16 %v49_v37, %v48_v36  ;;  %v981_v41 = vpack.c.bf16 %v67_v39, %v66_v38  ;;  %v50_v42 = vld [vmem:[%s1464_s3 + $0x60] sm:$0xff]  ;;  %v51_v43 = vld [vmem:[%s1464_s3 + $0x68] sm:$0xff]  ;;  %v68_v44 = vld [vmem:[%s1464_s3 + $0xf0] sm:$0xff] }
   0xb   :  { %v69_v45 = vld [vmem:[%s1464_s3 + $0xf8] sm:$0xff]  ;;  %v983_v46 = vpack.c.bf16 %v51_v43, %v50_v42  ;;  %v52_v48 = vld [vmem:[%s1464_s3 + $0x70] sm:$0xff]  ;;  %v70_v51 = vld [vmem:[%s1464_s3 + $0x100] sm:$0xff] }
   0xc   :  { %v985_v47 = vpack.c.bf16 %v69_v45, %v68_v44  ;;  %v53_v49 = vld [vmem:[%s1464_s3 + $0x78] sm:$0xff]  ;;  %v71_v52 = vld [vmem:[%s1464_s3 + $0x108] sm:$0xff]  ;;  %v35_v53 = vld [vmem:[%s1465_s0] sm:$0xff] }
   0xd   :  { %968 = vmatpush3.bf16.msra.mxu0 %v967_v21  ;;  %v987_v50 = vpack.c.bf16 %v53_v49, %v52_v48  ;;  %v990_v54 = vpack.c.bf16 %v71_v52, %v70_v51  ;;  %v72_v55 = vld [vmem:[%s1464_s3 + $0x110] sm:$0xff]  ;;  %v73_v56 = vld [vmem:[%s1464_s3 + $0x118] sm:$0xff]  ;;  %v74_v58 = vld [vmem:[%s1464_s3 + $0x120] sm:$0xff] }
   0xe   :  { %970 = vmatprep.subr.bf16.mxu0 %v969_v22  ;;  %v993_v57 = vpack.c.bf16 %v73_v56, %v72_v55  ;;  %v75_v59 = vld [vmem:[%s1464_s3 + $0x128] sm:$0xff]  ;;  %v76_v61 = vld [vmem:[%s1464_s3 + $0x130] sm:$0xff]  ;;  %v77_v62 = vld [vmem:[%s1464_s3 + $0x138] sm:$0xff] }
   0xf   :  { %v996_v60 = vpack.c.bf16 %v75_v59, %v74_v58  ;;  %v999_v63 = vpack.c.bf16 %v77_v62, %v76_v61  ;;  %v78_v0 = vld [vmem:[%s1464_s3 + $0x140] sm:$0xff]  ;;  %v79_v1 = vld [vmem:[%s1464_s3 + $0x148] sm:$0xff]  ;;  %v80_v5 = vld [vmem:[%s1464_s3 + $0x150] sm:$0xff] }
  0x10   :  { %v1002_v2 = vpack.c.bf16 %v79_v1, %v78_v0  ;;  %v81_v6 = vld [vmem:[%s1464_s3 + $0x158] sm:$0xff]  ;;  %v82_v8 = vld [vmem:[%s1464_s3 + $0x160] sm:$0xff]  ;;  %v83_v9 = vld [vmem:[%s1464_s3 + $0x168] sm:$0xff] }
  0x11   :  { %972 = vmatpush3.bf16.msra.mxu0 %v971_v28  ;;  %v1005_v7 = vpack.c.bf16 %v81_v6, %v80_v5  ;;  %v1008_v10 = vpack.c.bf16 %v83_v9, %v82_v8  ;;  %v84_v11 = vld [vmem:[%s1464_s3 + $0x170] sm:$0xff]  ;;  %v85_v12 = vld [vmem:[%s1464_s3 + $0x178] sm:$0xff]  ;;  %v228_v15 = vld [vmem:[%s1466_s4] sm:$0xff] }
  0x12   :  { %974 = vmatprep.subr.bf16.mxu0 %v973_v29  ;;  %v1011_v13 = vpack.c.bf16 %v85_v12, %v84_v11  ;;  %v37_v14 = vld [vmem:[%s1465_s0 + $0x10] sm:$0xff]  ;;  %v229_v16 = vld [vmem:[%s1466_s4 + $0x8] sm:$0xff]  ;;  %v231_v19 = vld [vmem:[%s1466_s4 + $0x18] sm:$0xff] }
  0x13   :  { %v1014_v17 = vpack.c.bf16 %v229_v16, %v228_v15  ;;  %v230_v18 = vld [vmem:[%s1466_s4 + $0x10] sm:$0xff]  ;;  %v86_v24 = vld [vmem:[%s1467_s8] ss:$0 sm:$0xff]  ;;  %v319_v30 = vld [vmem:[%s1468_s5 + $0x8] sm:$0x3f] }
  0x14   :  { %v1017_v20 = vpack.c.bf16 %v231_v19, %v230_v18  ;;  %v232_v31 = vld [vmem:[%s1467_s8 + $0x1] ss:$0 sm:$0xff]  ;;  %v321_v38 = vld [vmem:[%s1468_s5 + $0x18] sm:$0x3f]  ;;  %v320_v45 = vld [vmem:[%s1468_s5 + $0x10] sm:$0x3f] }
  0x15   :  { %976 = vmatpush3.bf16.msra.mxu0 %v975_v34  ;;  %1015 = vmatpush3.bf16.msra.mxu1 %v1014_v17  ;;  %v318_v37 = vld [vmem:[%s1468_s5] sm:$0x3f]  ;;  %v509_v49 = vld [vmem:[%s1470_s6 + $0x8] sm:$0xff]  ;;  %v601_v8 = vld [vmem:[%s1471_s7 + $0x10] sm:$0xff] }
  0x16   :  { %978 = vmatprep.subr.bf16.mxu0 %v977_v35  ;;  %1016 = vmatprep.subr.bf16.mxu1 %v1066_v3  ;;  %v508_v48 = vld [vmem:[%s1470_s6] sm:$0xff]  ;;  %v602_v9 = vld [vmem:[%s1471_s7 + $0x18] sm:$0xff]  ;;  %v604_v15 = vld [vmem:[%s1471_s7 + $0x28] sm:$0xff] }
  0x17   :  { %v599_v51 = vld [vmem:[%s1471_s7] sm:$0xff]  ;;  %v1026_v12 = vpack.c.bf16 %v602_v9, %v601_v8  ;;  %v605_v17 = vld [vmem:[%s1471_s7 + $0x30] sm:$0xff]  ;;  %v606_v18 = vld [vmem:[%s1471_s7 + $0x38] sm:$0xff] }
  0x18   :  { %v767_v55 = vld [vmem:[%s1467_s8 + $0x2] ss:$8 sm:$0xf]  ;;  %v1034_v19 = vpack.c.bf16 %v606_v18, %v605_v17 }
  0x19   :  { %980 = vmatpush3.bf16.msra.mxu0 %v979_v40  ;;  %1018 = vmatpush3.bf16.msra.mxu1 %v1017_v20  ;;  %v607_v20 = vld [vmem:[%s1471_s7 + $0x40] sm:$0xff] }
  0x1a   :  { %982 = vmatprep.subr.bf16.mxu0 %v981_v41  ;;  %768 = vmatprep.subr.msk.mxu1 %vm349_vm2, %v319_v30  ;;  %v311_v41 = vld [vmem:[%s1469_s2] sm:$0xff]  ;;  %v614_v30 = vld [vmem:[%s1471_s7 + $0x78] sm:$0xff] }
  0x1d   :  { %984 = vmatpush3.bf16.msra.mxu0 %v983_v46 }
  0x1e   :  { %986 = vmatprep.subr.bf16.mxu0 %v985_v47 }
  0x21   :  { %988 = vmatpush3.bf16.msra.mxu0 %v987_v50  ;;  %v1020_v50 = vpack.c.bf16 %v509_v49, %v508_v48 }
  0x22   :  { %989 = vmatprep.subr.bf16.mxu0 %v1066_v3 }
  0x24   :  { %152 = vmatmul.mubr.f32.vlgmr.msra.gmra.mrb[0].mxu0 %v35_v53 }
  0x25   :  { %991 = vmatpush3.bf16.msra.mxu0 %v990_v54  ;;  %892 = vmatprep.mubr.msk.f32.mxu0 %vm1067_vm0, %v1068_v4 }
  0x26   :  { %992 = vmatprep.subr.bf16.mxu0 %v1066_v3 }
  0x29   :  { %994 = vmatpush3.bf16.msra.mxu0 %v993_v57 }
  0x2a   :  { %995 = vmatprep.subr.bf16.mxu0 %v1066_v3 }
  0x2d   :  { %997 = vmatpush3.bf16.msra.mxu0 %v996_v60 }
  0x2e   :  { %998 = vmatprep.subr.bf16.mxu0 %v1066_v3 }
  0x31   :  { %1000 = vmatpush3.bf16.msra.mxu0 %v999_v63 }
  0x32   :  { %1001 = vmatprep.subr.bf16.mxu0 %v1066_v3 }
  0x35   :  { %1003 = vmatpush3.bf16.msra.mxu0 %v1002_v2 }
  0x36   :  { %1004 = vmatprep.subr.bf16.mxu0 %v1066_v3 }
  0x39   :  { %1006 = vmatpush3.bf16.msra.mxu0 %v1005_v7 }
  0x3a   :  { %1007 = vmatprep.subr.bf16.mxu0 %v1066_v3 }
  0x3d   :  { %1009 = vmatpush3.bf16.msra.mxu0 %v1008_v10 }
  0x3e   :  { %1010 = vmatprep.subr.bf16.mxu0 %v1066_v3 }
  0x41   :  { %1012 = vmatpush3.bf16.msra.mxu0 %v1011_v13  ;;  %v591_v13 = vld [vmem:[%s1473_s1] sm:$0xff] }
  0x44   :  { %893 = vmatmul.mubr.f32.vlgmr.msra.gmra.mrb[2].mxu0 %v37_v14  ;;  %v603_v14 = vld [vmem:[%s1471_s7 + $0x20] sm:$0xff] }
  0x45   :  { %v1030_v16 = vpack.c.bf16 %v604_v15, %v603_v14 }
  0xf7   :  { %v808_v21 = vpop.f32.mrb[0].mxu0 }
  0xf8   :  { %v809_v22 = vpop.f32.mrb[1].mxu0 }
  0xf9   :  { %v810_v23 = vadd.f32 %v809_v22, %v808_v21  ;;  %v608_v21 = vld [vmem:[%s1471_s7 + $0x48] sm:$0xff] }
  0xfa   :  { %v1038_v22 = vpack.c.bf16 %v608_v21, %v607_v20 }
  0xfb   :  { %v154_v25 = vadd.f32 %v810_v23, %v86_v24  ;;  %v609_v23 = vld [vmem:[%s1471_s7 + $0x50] sm:$0xff]  ;;  %v610_v24 = vld [vmem:[%s1471_s7 + $0x58] sm:$0xff] }
 0x117   :  { %v223_v26 = vpop.f32.mrb[2].mxu0 }
 0x118   :  { %v224_v27 = vadd.f32 %v223_v26, %v154_v25  ;;  %v894_v28 = vpop.f32.mrb[3].mxu0  ;;  %v1042_v25 = vpack.c.bf16 %v610_v24, %v609_v23  ;;  %v611_v26 = vld [vmem:[%s1471_s7 + $0x60] sm:$0xff] }
 0x11a   :  { %v227_v29 = vmax.f32 %v224_v27, 0.0  ;;  %v612_v27 = vld [vmem:[%s1471_s7 + $0x68] sm:$0xff] }
 0x11b   :  { %v1046_v28 = vpack.c.bf16 %v612_v27, %v611_v26 }
 0x11c   :  { %904 = vmatmul.mubr.msk.f32.vlgmr.msra.gmra.mrb[0].mxu1 %vm233_vm1, %v227_v29  ;;  %v613_v29 = vld [vmem:[%s1471_s7 + $0x70] sm:$0xff] }
 0x11d   :  { %426 = vmatprep.mubr.f32.mxu1 %v1068_v4  ;;  %769 = vmatpush1.msk.msra.mxu1 %vm349_vm2, %v318_v37  ;;  %v597_v37 = vld [vmem:[%s1473_s1 + $0x30] sm:$0xff] }
 0x11e   :  { %771 = vmatprep.subr.msk.mxu1 %vm349_vm2, %v321_v38  ;;  %v598_v38 = vld [vmem:[%s1473_s1 + $0x38] sm:$0xff] }
 0x1ef   :  { %v303_v32 = vpop.f32.mrb[0].mxu1 }
 0x1f0   :  { %v304_v33 = vadd.f32 %v303_v32, %v232_v31  ;;  %v905_v34 = vpop.f32.mrb[1].mxu1  ;;  %v1050_v31 = vpack.c.bf16 %v614_v30, %v613_v29  ;;  %v592_v32 = vld [vmem:[%s1473_s1 + $0x8] sm:$0xff] }
 0x1f1   :  { %v594_v34 = vld [vmem:[%s1473_s1 + $0x18] sm:$0xff] }
 0x1f2   :  { %v307_v35 = vmul.f32 0.5, %v304_v33 }
 0x1f4   :  { %v308_v36 = vmul.f32 1.442695, %v307_v35  ;;  %v595_v35 = vld [vmem:[%s1473_s1 + $0x20] sm:$0xff] }
 0x1f6   :  { %1060 = vpow2.f32 %v308_v36  ;;  %v596_v36 = vld [vmem:[%s1473_s1 + $0x28] sm:$0xff] }
 0x200   :  { %v1061_v39 = vpop.eup %1060 }
 0x201   :  { %313 = vrot.lane.b32.xlu0 %v1061_v39, %s1069_s20  ;;  %v310_v40 = vmul.f32 %v1061_v39, %v1061_v39  ;;  %v510_v39 = vld [vmem:[%s1467_s8 + $0x3] ss:$0 sm:$0xff] }
 0x203   :  { %733 = vrot.lane.b32.xlu1 %v310_v40, %s1070_s21 }
 0x205   :  { %729 = vrot.lane.b32.xlu0 %v304_v33, %s1070_s21 }
 0x273   :  { %v314_v42 = vpop.permute.xlu0 %313 }
 0x274   :  { %v316_v43 = vmul.f32 %v314_v42, %v311_v41 }
 0x276   :  { %v317_v44 = vadd.f32 %v316_v43, %v304_v33  ;;  %v593_v33 = vld [vmem:[%s1473_s1 + $0x10] sm:$0xff] }
 0x277   :  { %v730_v46 = vpop.permute.xlu0 %729 }
 0x278   :  { %v1336_v47 = vsel %vm345_vm3, %v317_v44, %v730_v46  ;;  %770 = vmatmul.mubr.msk.f32.vlgmr.msra.gmra.mrb[2].mxu1 %vm345_vm3, %v317_v44 }
 0x279   :  { %772 = vmatpush1.msk.msra.mxu1 %vm349_vm2, %v320_v45  ;;  %497 = vmatprep.mubr.f32.mxu1 %v1068_v4 }
 0x27a   :  { %1019 = vmatprep.subr.bf16.mxu1 %v1066_v3  ;;  %v600_v3 = vld [vmem:[%s1471_s7 + $0x8] sm:$0xff] }
 0x27b   :  { %v1022_v52 = vpack.c.bf16 %v600_v3, %v599_v51 }
 0x27c   :  { %773 = vmatmul.mubr.msk.f32.vlgmr.msra.gmra.mrb[4].mxu1 %vm345_vm3, %v317_v44 }
 0x27d   :  { %910 = vmatprep.mubr.msk.f32.mxu1 %vm1067_vm0, %v1068_v4  ;;  %1021 = vmatpush3.bf16.msra.mxu1 %v1020_v50  ;;  %v325_v4 = vlaneseq }
 0x27e   :  { %1023 = vmatprep.subr.bf16.mxu1 %v1022_v52 }
 0x27f   :  { %v326_v53 = vshrl.u32 %v325_v4, 7 }
 0x281   :  { %v327_v54 = vsub.s32 0, %v326_v53  ;;  %v331_v56 = vsub.s32 1, %v326_v53  ;;  %v335_v58 = vsub.s32 2, %v326_v53  ;;  %v339_v60 = vsub.s32 3, %v326_v53 }
 0x283   :  { %v328_v57 = vrot.slane %v767_v55, %v327_v54  ;;  %v332_v59 = vrot.slane %v767_v55, %v331_v56  ;;  %v336_v0 = vrot.slane %v767_v55, %v335_v58  ;;  %v340_v2 = vrot.slane %v767_v55, %v339_v60  ;;  %v734_v54 = vpop.permute.xlu1 %733 }
 0x284   :  { %v746_v56 = vsel %vm745_vm5, %v1336_v47, %v734_v54 }
 0x34b   :  { %v428_v61 = vpop.f32.mrb[2].mxu1 }
 0x34c   :  { %v429_v62 = vadd.f32 %v428_v61, %v328_v57  ;;  %v430_v63 = vpop.f32.mrb[3].mxu1 }
 0x34d   :  { %v431_v1 = vadd.f32 %v430_v63, %v332_v59 }
 0x34e   :  { %504 = vst [vmem:[%s1472_s10] sm:$0xff] %v429_v62 }
 0x34f   :  { %505 = vst [vmem:[%s1472_s10 + $0x8] sm:$0xff] %v431_v1  ;;  %v499_v5 = vpop.f32.mrb[4].mxu1 }
 0x350   :  { %v500_v6 = vadd.f32 %v499_v5, %v336_v0  ;;  %v501_v7 = vpop.f32.mrb[5].mxu1 }
 0x351   :  { %v502_v10 = vadd.f32 %v501_v7, %v340_v2 }
 0x352   :  { %506 = vst [vmem:[%s1472_s10 + $0x10] sm:$0xff] %v500_v6 }
 0x353   :  { %v507_v11 = vmax.f32 %v502_v10, 0.0 }
 0x355   :  { %911 = vmatmul.mubr.msk.f32.vlgmr.msra.gmra.mrb[6].mxu1 %vm511_vm4, %v507_v11 }
 0x356   :  { %1025 = vmatpush3.bf16.msra.mxu1 %v1022_v52  ;;  %945 = vmatprep.mubr.f32.mxu1 %v591_v13 }
 0x357   :  { %1027 = vmatprep.subr.bf16.mxu1 %v1026_v12 }
 0x35a   :  { %1029 = vmatpush3.bf16.msra.mxu1 %v1026_v12 }
 0x35b   :  { %1031 = vmatprep.subr.bf16.mxu1 %v1030_v16 }
 0x35e   :  { %1033 = vmatpush3.bf16.msra.mxu1 %v1030_v16 }
 0x35f   :  { %1035 = vmatprep.subr.bf16.mxu1 %v1034_v19 }
 0x362   :  { %1037 = vmatpush3.bf16.msra.mxu1 %v1034_v19 }
 0x363   :  { %1039 = vmatprep.subr.bf16.mxu1 %v1038_v22 }
 0x366   :  { %1041 = vmatpush3.bf16.msra.mxu1 %v1038_v22 }
 0x367   :  { %1043 = vmatprep.subr.bf16.mxu1 %v1042_v25 }
 0x36a   :  { %1045 = vmatpush3.bf16.msra.mxu1 %v1042_v25 }
 0x36b   :  { %1047 = vmatprep.subr.bf16.mxu1 %v1046_v28 }
 0x36e   :  { %1049 = vmatpush3.bf16.msra.mxu1 %v1046_v28 }
 0x36f   :  { %1051 = vmatprep.subr.bf16.mxu1 %v1050_v31 }
 0x372   :  { %1053 = vmatpush3.bf16.msra.mxu1 %v1050_v31 }
 0x375   :  { %946 = vmatmul.mubr.f32.vlgmr.msra.gmra.mrb[8].mxu1 %v592_v32 }
 0x376   :  { %948 = vmatprep.mubr.f32.mxu1 %v593_v33 }
 0x379   :  { %949 = vmatmul.mubr.f32.gmra.mrb[10].mxu1 %v594_v34 }
 0x37a   :  { %951 = vmatprep.mubr.f32.mxu1 %v595_v35 }
 0x37d   :  { %952 = vmatmul.mubr.f32.gmra.mrb[12].mxu1 %v596_v36 }
 0x37e   :  { %954 = vmatprep.mubr.f32.mxu1 %v597_v37 }
 0x381   :  { %955 = vmatmul.mubr.f32.gmra.mrb[14].mxu1 %v598_v38 }
 0x428   :  { %v581_v40 = vpop.f32.mrb[6].mxu1 }
 0x429   :  { %v582_v41 = vadd.f32 %v581_v40, %v510_v39  ;;  %v912_v42 = vpop.f32.mrb[7].mxu1 }
 0x42b   :  { %v775_v43 = vmul.f32 -1.442695, %v582_v41  ;;  %737 = vrot.lane.b32.xlu1 %v582_v41, %s1071_s12 }
 0x42d   :  { %1062 = vpow2.f32 %v775_v43 }
 0x437   :  { %v1063_v44 = vpop.eup %1062 }
 0x438   :  { %v588_v45 = vadd.f32 1.0, %v1063_v44 }
 0x43a   :  { %1064 = vrcp.f32 %v588_v45 }
 0x444   :  { %v1065_v46 = vpop.eup %1064 }
 0x445   :  { %741 = vrot.lane.b32.xlu0 %v1065_v46, %s1071_s12 }
 0x448   :  { %v947_v48 = vpop.f32.mrb[8].mxu1 }
 0x449   :  { %721 = vst [vmem:[%s1474_s9 + $0x8] sm:$0xff] %v947_v48  ;;  %v681_v49 = vpop.f32.mrb[9].mxu1 }
 0x44a   :  { %720 = vst [vmem:[%s1474_s9] sm:$0xff] %v681_v49 }
 0x44c   :  { %v950_v50 = vpop.f32.mrb[10].mxu1 }
 0x44d   :  { %723 = vst [vmem:[%s1474_s9 + $0x18] sm:$0xff] %v950_v50  ;;  %v691_v51 = vpop.f32.mrb[11].mxu1 }
 0x44e   :  { %722 = vst [vmem:[%s1474_s9 + $0x10] sm:$0xff] %v691_v51 }
 0x450   :  { %v953_v3 = vpop.f32.mrb[12].mxu1 }
 0x451   :  { %725 = vst [vmem:[%s1474_s9 + $0x28] sm:$0xff] %v953_v3  ;;  %v701_v52 = vpop.f32.mrb[13].mxu1 }
 0x452   :  { %724 = vst [vmem:[%s1474_s9 + $0x20] sm:$0xff] %v701_v52 }
 0x454   :  { %v956_v4 = vpop.f32.mrb[14].mxu1 }
 0x455   :  { %727 = vst [vmem:[%s1474_s9 + $0x38] sm:$0xff] %v956_v4  ;;  %v711_v53 = vpop.f32.mrb[15].mxu1 }
 0x456   :  { %726 = vst [vmem:[%s1474_s9 + $0x30] sm:$0xff] %v711_v53 }
 0x49d   :  { %v738_v55 = vpop.permute.xlu1 %737 }
 0x49e   :  { %v748_v57 = vsel %vm747_vm6, %v746_v56, %v738_v55 }
 0x4b7   :  { %v742_v58 = vpop.permute.xlu0 %741 }
 0x4b8   :  { %v750_v59 = vsel %vm749_vm7, %v748_v57, %v742_v58 }
 0x4b9   :  { %v752_v60 = vsel %vm751_vm8, %v750_v59, 0.0 }
 0x4ba   :  { %753 = vst [vmem:[%s1475_s11] sm:$0xff] %v752_v60 }

</bundles_post_ra>
